<compile_context>
chip_gen: v7x
topology: tpu7x:2x2x1
jax: 0.10.0
libtpu: 0.0.40
codegen_flags: <defaults>
</compile_context>

<pallas_src>
import functools

import jax
import jax.numpy as jnp
from jax.experimental import pallas as pl
from jax.experimental.pallas import tpu as pltpu

ALPHA = 0.25
GAMMA = 2.0

_LANES = 128


def _sublane_multiple(itemsize):
    # Native sublane packing: (8,128) f32, (16,128) bf16, (32,128) int8/fp8.
    return {4: 8, 2: 16, 1: 32}.get(itemsize, 8)


def _vmem_limit_bytes():
    """Scoped-VMEM limit derived from this chip's physical VMEM."""
    try:
        cap = int(pltpu.get_tpu_info().vmem_capacity_bytes)
    except Exception:
        cap = 64 * 1024 * 1024  # conservative fallback: v7x per-core VMEM
    # ~25% headroom for Mosaic internals; 48 MiB on v7x, 96 MiB on v5e/v6e.
    return max(32 * 1024 * 1024, min(cap * 3 // 4, 96 * 1024 * 1024))


def _choose_tile_rows(n_rows, row_width, itemsize, vmem_limit, n_temps):
    """Largest row tile whose double-buffered input blocks plus in-kernel f32
    temporaries fit the VMEM budget (also capped at ~8 MiB of real HBM bytes
    per block -- far past the point where the ~0.35us grid-step overhead is
    negligible)."""
    sub = _sublane_multiple(itemsize)
    lanes = max(pl.cdiv(row_width, _LANES) * _LANES, _LANES)
    budget = max(vmem_limit - 8 * 1024 * 1024, 8 * 1024 * 1024)
    per_row = (2 * lanes * itemsize      # double-buffered logits block
               + n_temps * lanes * 4     # f32 temporaries inside the kernel
               + 2 * _LANES * 4)         # double-buffered targets block
    rows = int(budget // per_row)
    rows = min(rows, (8 * 1024 * 1024) // max(row_width * itemsize, 1))
    if rows >= n_rows:
        return n_rows                    # single (possibly partial) block
    return max(sub, (rows // sub) * sub)


def _focal_weight(w, gamma):
    if gamma == 2.0:
        return w * w                     # avoid float pow (log+exp on EUP)
    if gamma == 1.0:
        return w
    return w ** gamma


# --------------------------------------------------------------------------
# Kernel bodies
# --------------------------------------------------------------------------

def _plain_kernel(logits_ref, targets_ref, out_ref, *,
                  inner_tiles, tile_rows, n_valid, alpha, gamma):
    """One sample per row: logits (T, C), targets (T, 1) int32."""
    p, i = pl.program_id(0), pl.program_id(1)
    t = p * inner_tiles + i                                # logical tile index

    @pl.when(i == 0)
    def _():
        out_ref[...] = jnp.zeros_like(out_ref)

    x = logits_ref[...].astype(jnp.float32)                # (T, C)
    tgt = targets_ref[...]                                 # (T, 1) int32

    m = jnp.max(x, axis=-1, keepdims=True)
    z = x - m
    lse = jnp.log(jnp.sum(jnp.exp(z), axis=-1, keepdims=True))
    cls = jax.lax.broadcasted_iota(jnp.int32, x.shape, 1)
    z_t = jnp.sum(jnp.where(cls == tgt, z, 0.0), axis=-1, keepdims=True)

    ce = lse - z_t
    pt = jnp.exp(z_t - lse)
    focal = alpha * _focal_weight(jnp.maximum(1.0 - pt, 0.0), gamma) * ce

    # Mask rows past the end of the array (select, never arithmetic masking).
    row = jax.lax.broadcasted_iota(jnp.int32, focal.shape, 0) + t * tile_rows
    focal = jnp.where(row < n_valid, focal, 0.0)
    out_ref[...] += jnp.sum(focal)


def _packed_kernel(logits_ref, targets_ref, out_ref, *,
                   inner_tiles, tile_rows, n_valid, num_classes,
                   bits_per_target, alpha, gamma):
    """k samples per 128-lane row: logits (T, k*C), targets (T, 1) int32 with
    the k class ids bit-packed (bits_per_target bits each)."""
    p, i = pl.program_id(0), pl.program_id(1)
    t = p * inner_tiles + i

    @pl.when(i == 0)
    def _():
        out_ref[...] = jnp.zeros_like(out_ref)

    c = num_classes
    nb = bits_per_target
    x = logits_ref[...].astype(jnp.float32)                # (T, k*C) lane-dense
    tbits = targets_ref[...]                               # (T, 1) int32

    lane = jax.lax.broadcasted_iota(jnp.int32, x.shape, 1)
    seg = lane // c                                        # sample slot in row
    pos = lane - seg * c                                   # class within sample
    tgt = jnp.right_shift(tbits, seg * nb) & (c - 1)       # that slot's target
    is_tgt = pos == tgt                                    # per-lane one-hot

    # Row max keeps exp() in range; per-sample normalizer via a
    # block-diagonal segment-sum on the MXU (no cross-lane XLU traffic).
    m = jnp.max(x, axis=-1, keepdims=True)
    e = jnp.exp(x - m)
    lw = x.shape[-1]
    ra = jax.lax.broadcasted_iota(jnp.int32, (lw, lw), 0) // c
    rb = jax.lax.broadcasted_iota(jnp.int32, (lw, lw), 1) // c
    seg_mat = (ra == rb).astype(jnp.float32)               # block-diag ones
    s_seg = jnp.dot(e, seg_mat, preferred_element_type=jnp.float32)

    ce = jnp.log(s_seg) - (x - m)                          # per-lane CE
    pt = e / s_seg                                         # per-lane softmax
    focal = alpha * _focal_weight(jnp.maximum(1.0 - pt, 0.0), gamma) * ce

    row = jax.lax.broadcasted_iota(jnp.int32, x.shape, 0) + t * tile_rows
    keep = is_tgt & (row < n_valid)
    out_ref[...] += jnp.sum(jnp.where(keep, focal, 0.0))


# --------------------------------------------------------------------------
# Launcher / wrapper
# --------------------------------------------------------------------------

def _launch(kernel, logits2d, targets2d, tile_rows, vmem_limit):
    n_rows, row_width = logits2d.shape
    n_tiles = pl.cdiv(n_rows, tile_rows)
    num_splits = 2 if n_tiles >= 2 else 1      # both TensorCores on v7x
    inner = pl.cdiv(n_tiles, num_splits)

    last = n_tiles - 1
    if num_splits * inner == n_tiles:
        def row_map(p, i):
            return (p * inner + i, 0)
    else:
        # One overhanging tile when n_tiles is odd: clamp its DMA index (the
        # duplicated rows are discarded by the in-kernel row mask).
        def row_map(p, i):
            return (jnp.minimum(p * inner + i, last), 0)

    partials = pl.pallas_call(
        functools.partial(kernel, inner_tiles=inner, tile_rows=tile_rows),
        out_shape=jax.ShapeDtypeStruct((num_splits, 1, 1), jnp.float32),
        grid_spec=pltpu.PrefetchScalarGridSpec(
            num_scalar_prefetch=0,
            grid=(num_splits, inner),
            in_specs=[
                pl.BlockSpec((tile_rows, row_width), row_map),   # logits tile
                pl.BlockSpec((tile_rows, 1), row_map),           # targets tile
            ],
            out_specs=pl.BlockSpec((1, 1, 1), lambda p, i: (p, 0, 0)),
        ),
        compiler_params=pltpu.CompilerParams(
            dimension_semantics=("parallel", "arbitrary"),
            vmem_limit_bytes=vmem_limit,
        ),
    )(logits2d, targets2d)
    return jnp.sum(partials)


def focal_loss(logits, targets, *, alpha=ALPHA, gamma=GAMMA,
               reduction="mean", tile_rows=None, use_packing=True):
    """logits: (N, C) float; targets: (N,) integer class ids. Scalar loss."""
    n, c = logits.shape
    if reduction == "mean":
        denom = float(n)
    elif reduction == "sum":
        denom = 1.0
    else:
        # TODO(synk): reduction='none' (per-sample vector output) not implemented in-kernel.
        raise NotImplementedError("only 'mean' and 'sum' reductions are supported")

    vmem_limit = _vmem_limit_bytes()
    itemsize = logits.dtype.itemsize
    targets = targets.astype(jnp.int32)

    # Lane packing for small class counts (C a power of two, 2..64) when N is
    # divisible by the pack factor.
    k = 0
    if use_packing and 2 <= c <= 64 and (c & (c - 1)) == 0:
        nb = max(1, (c - 1).bit_length())              # bits per target
        k = min(_LANES // c, 32 // nb)
        k = 1 << (k.bit_length() - 1)                  # power of two
        if k < 2 or n % k != 0:
            k = 0

    if k:
        n_rows, row_width = n // k, k * c
        logits2d = logits.reshape(n_rows, row_width)   # free contiguous reshape
        shifts = (jnp.arange(k, dtype=jnp.int32) * nb)[None, :]
        tbits = jnp.sum(jnp.left_shift(targets.reshape(n_rows, k), shifts),
                        axis=1, keepdims=True).astype(jnp.int32)
        tr = tile_rows or _choose_tile_rows(n_rows, row_width, itemsize,
                                            vmem_limit, n_temps=8)
        kern = functools.partial(
            _packed_kernel, n_valid=n_rows, num_classes=c,
            bits_per_target=nb, alpha=alpha, gamma=gamma)
        try:
            total = _launch(kern, logits2d, tbits, tr, vmem_limit)
            return total if denom == 1.0 else total / denom
        except Exception:
            pass  # robust fallback to the plain (unpacked) path below

    logits2d = logits
    targets2d = targets.reshape(n, 1)
    tr = tile_rows or _choose_tile_rows(n, c, itemsize, vmem_limit, n_temps=6)
    kern = functools.partial(_plain_kernel, n_valid=n, alpha=alpha, gamma=gamma)
    total = _launch(kern, logits2d, targets2d, tr, vmem_limit)
    return total if denom == 1.0 else total / denom


def focal_loss_ref(logits, targets, alpha=ALPHA, gamma=GAMMA, reduction="mean"):
    # Pure-JAX reference mirroring torch.nn.functional.cross_entropy + focal.
    logp = jax.nn.log_softmax(logits.astype(jnp.float32), axis=-1)
    ce = -jnp.take_along_axis(logp, targets[:, None].astype(jnp.int32), axis=-1)[:, 0]
    pt = jnp.exp(-ce)
    focal = alpha * (1.0 - pt) ** gamma * ce
    return jnp.mean(focal) if reduction == "mean" else jnp.sum(focal)


if __name__ == "__main__":
    key = jax.random.PRNGKey(0)
    k1, k2 = jax.random.split(key)
    N, C = 200, 16
    logits = jax.random.normal(k1, (N, C), dtype=jnp.float32)
    targets = jax.random.randint(k2, (N,), 0, C, dtype=jnp.int32)

    ref_mean = focal_loss_ref(logits, targets)
    ref_sum = focal_loss_ref(logits, targets, reduction="sum")

    # 1) Default path: lane-packed (8 samples per 128-lane row), auto tile.
    out1 = jax.block_until_ready(focal_loss(logits, targets))
    # 2) Packed path with a tiny forced tile: exercises multi-tile
    #    accumulation, the megacore split and partial-tile masking.
    out2 = jax.block_until_ready(focal_loss(logits, targets, tile_rows=8))
    # 3) Plain (unpacked) path, forced multi-tile with a masked partial tile.
    out3 = jax.block_until_ready(
        focal_loss(logits, targets, use_packing=False, tile_rows=64))
    # 4) Sum reduction.
    out4 = jax.block_until_ready(focal_loss(logits, targets, reduction="sum"))

    assert jnp.allclose(out1, ref_mean, rtol=1e-5, atol=1e-5), (out1, ref_mean)
    assert jnp.allclose(out2, ref_mean, rtol=1e-5, atol=1e-5), (out2, ref_mean)
    assert jnp.allclose(out3, ref_mean, rtol=1e-5, atol=1e-5), (out3, ref_mean)
    assert jnp.allclose(out4, ref_sum, rtol=1e-5, atol=1e-5), (out4, ref_sum)
    print("KERNEL_OK")
</pallas_src>

<mosaic_0001>
module attributes {stable_mosaic.version = 11 : i64} {
  func.func @_plain_kernel(%arg0: i32, %arg1: i32, %arg2: memref<200x16xf32, #tpu.memory_space<vmem>>, %arg3: memref<200x1xi32, #tpu.memory_space<vmem>>, %arg4: memref<1x1x1xf32, #tpu.memory_space<vmem>>) attributes {dimension_semantics = [#tpu.dimension_semantics<parallel>, #tpu.dimension_semantics<arbitrary>], iteration_bounds = array<i64: 1, 1>, scalar_prefetch = 0 : i64, scratch_operands = 0 : i64, tpu.core_type = #tpu.core_type<tc>, window_params = [{transform_indices = @transform_0, window_bounds = array<i64: 200, 16>}, {transform_indices = @transform_1, window_bounds = array<i64: 200, 1>}, {transform_indices = @transform_2, window_bounds = array<i64: 1, 1, 1>}]} {
    %c1_i32 = arith.constant 1 : i32
    %0 = arith.muli %arg0, %c1_i32 : i32
    %1 = arith.addi %0, %arg1 : i32
    %c0_i32 = arith.constant 0 : i32
    %2 = arith.cmpi eq, %arg1, %c0_i32 : i32
    %3 = arith.extui %2 : i1 to i32
    %c0_i32_0 = arith.constant 0 : i32
    %4 = arith.cmpi ne, %3, %c0_i32_0 : i32
    scf.if %4 {
      %cst_19 = arith.constant 0.000000e+00 : f32
      %49 = vector.broadcast %cst_19 : f32 to vector<1x1x1xf32>
      %c0_20 = arith.constant 0 : index
      %c0_21 = arith.constant 0 : index
      %c0_22 = arith.constant 0 : index
      %50 = vector.load %arg4[%c0_20, %c0_21, %c0_22] : memref<1x1x1xf32, #tpu.memory_space<vmem>>, vector<1x1x1xf32>
      tpu.vector_store %arg4[%c0_20, %c0_21, %c0_22], %49 {strides = array<i32>} : memref<1x1x1xf32, #tpu.memory_space<vmem>>, vector<1x1x1xf32>,
    } else {
    }
    %c0 = arith.constant 0 : index
    %c0_1 = arith.constant 0 : index
    %5 = vector.load %arg2[%c0, %c0_1] : memref<200x16xf32, #tpu.memory_space<vmem>>, vector<200x16xf32>
    %c0_2 = arith.constant 0 : index
    %c0_3 = arith.constant 0 : index
    %6 = vector.load %arg3[%c0_2, %c0_3] : memref<200x1xi32, #tpu.memory_space<vmem>>, vector<200x1xi32>
    %cst = arith.constant dense<0xFF800000> : vector<200xf32>
    %7 = vector.multi_reduction <maximumf>, %5, %cst [1] : vector<200x16xf32> to vector<200xf32>
    %8 = vector.shape_cast %7 : vector<200xf32> to vector<200x1xf32>
    %9 = vector.broadcast %8 : vector<200x1xf32> to vector<200x16xf32>
    %10 = arith.subf %5, %9 : vector<200x16xf32>
    %11 = math.exp %10 : vector<200x16xf32>
    %cst_4 = arith.constant dense<0.000000e+00> : vector<200xf32>
    %12 = vector.multi_reduction <add>, %11, %cst_4 [1] : vector<200x16xf32> to vector<200xf32>
    %13 = vector.shape_cast %12 : vector<200xf32> to vector<200x1xf32>
    %14 = math.log %13 : vector<200x1xf32>
    %15 = tpu.iota {dimensions = array<i32: 1>} : vector<200x16xi32>
    %16 = vector.broadcast %6 : vector<200x1xi32> to vector<200x16xi32>
    %17 = arith.cmpi eq, %15, %16 : vector<200x16xi32>
    %cst_5 = arith.constant 0.000000e+00 : f32
    %18 = vector.broadcast %cst_5 : f32 to vector<200x16xf32>
    %19 = arith.select %17, %10, %18 : vector<200x16xi1>, vector<200x16xf32>
    %cst_6 = arith.constant dense<0.000000e+00> : vector<200xf32>
    %20 = vector.multi_reduction <add>, %19, %cst_6 [1] : vector<200x16xf32> to vector<200xf32>
    %21 = vector.shape_cast %20 : vector<200xf32> to vector<200x1xf32>
    %22 = arith.subf %14, %21 : vector<200x1xf32>
    %23 = arith.subf %21, %14 : vector<200x1xf32>
    %24 = math.exp %23 : vector<200x1xf32>
    %cst_7 = arith.constant 1.000000e+00 : f32
    %25 = vector.broadcast %cst_7 : f32 to vector<200x1xf32>
    %26 = arith.subf %25, %24 : vector<200x1xf32>
    %cst_8 = arith.constant 0.000000e+00 : f32
    %27 = vector.broadcast %cst_8 : f32 to vector<200x1xf32>
    %28 = arith.maximumf %26, %27 : vector<200x1xf32>
    %29 = arith.mulf %28, %28 : vector<200x1xf32>
    %cst_9 = arith.constant 2.500000e-01 : f32
    %30 = vector.broadcast %cst_9 : f32 to vector<200x1xf32>
    %31 = arith.mulf %30, %29 : vector<200x1xf32>
    %32 = arith.mulf %31, %22 : vector<200x1xf32>
    %33 = tpu.iota {dimensions = array<i32: 0>} : vector<200x1xi32>
    %c200_i32 = arith.constant 200 : i32
    %34 = arith.muli %1, %c200_i32 : i32
    %35 = vector.broadcast %34 : i32 to vector<200x1xi32>
    %36 = arith.addi %33, %35 : vector<200x1xi32>
    %c200_i32_10 = arith.constant 200 : i32
    %37 = vector.broadcast %c200_i32_10 : i32 to vector<200x1xi32>
    %38 = arith.cmpi slt, %36, %37 : vector<200x1xi32>
    %cst_11 = arith.constant 0.000000e+00 : f32
    %39 = vector.broadcast %cst_11 : f32 to vector<200x1xf32>
    %40 = arith.select %38, %32, %39 : vector<200x1xi1>, vector<200x1xf32>
    %c0_12 = arith.constant 0 : index
    %c0_13 = arith.constant 0 : index
    %c0_14 = arith.constant 0 : index
    %41 = vector.load %arg4[%c0_12, %c0_13, %c0_14] : memref<1x1x1xf32, #tpu.memory_space<vmem>>, vector<1x1x1xf32>
    %42 = vector.shape_cast %40 : vector<200x1xf32> to vector<1x200x1xf32>
    %cst_15 = arith.constant dense<0.000000e+00> : vector<1xf32>
    %43 = vector.multi_reduction <add>, %42, %cst_15 [1, 2] : vector<1x200x1xf32> to vector<1xf32>
    %44 = vector.shape_cast %43 : vector<1xf32> to vector<1x1x1xf32>
    %45 = vector.extract %44[0, 0, 0] : f32 from vector<1x1x1xf32>
    %46 = vector.broadcast %45 : f32 to vector<1x1x1xf32>
    %47 = arith.addf %41, %46 : vector<1x1x1xf32>
    %c0_16 = arith.constant 0 : index
    %c0_17 = arith.constant 0 : index
    %c0_18 = arith.constant 0 : index
    %48 = vector.load %arg4[%c0_16, %c0_17, %c0_18] : memref<1x1x1xf32, #tpu.memory_space<vmem>>, vector<1x1x1xf32>
    tpu.vector_store %arg4[%c0_16, %c0_17, %c0_18], %47 {strides = array<i32>} : memref<1x1x1xf32, #tpu.memory_space<vmem>>, vector<1x1x1xf32>,
    return
  }
  func.func @transform_0(%arg0: i32, %arg1: i32) -> (i32, i32) {
    %c1_i32 = arith.constant 1 : i32
    %0 = arith.muli %arg0, %c1_i32 : i32
    %1 = arith.addi %0, %arg1 : i32
    %c0_i32 = arith.constant 0 : i32
    %c0_i32_0 = arith.constant 0 : i32
    return %1, %c0_i32 : i32, i32
  }
  func.func @transform_1(%arg0: i32, %arg1: i32) -> (i32, i32) {
    %c1_i32 = arith.constant 1 : i32
    %0 = arith.muli %arg0, %c1_i32 : i32
    %1 = arith.addi %0, %arg1 : i32
    %c0_i32 = arith.constant 0 : i32
    %c0_i32_0 = arith.constant 0 : i32
    return %1, %c0_i32 : i32, i32
  }
  func.func @transform_2(%arg0: i32, %arg1: i32) -> (i32, i32, i32) {
    %c0_i32 = arith.constant 0 : i32
    %c0_i32_0 = arith.constant 0 : i32
    %c0_i32_1 = arith.constant 0 : i32
    return %arg0, %c0_i32, %c0_i32_0 : i32, i32, i32
  }
}

</mosaic_0001>

<bundles_post_ra>
// kernel: tpu_custom_call.1
= control target key start
LH: loop header
LB: loop body
LE: loop exit
PB: predicated region body
PF: predicated region fallthrough
CT: control target
= control target key end

     0   :  { %vm113_vm0 = vcmask 130048   ;;  %v1190_v6 = vmov 0   ;;  %s1935_s0 = inlined_call_operand.vmem [shape: f32[200,16], index: 0, kind: input, shape index: {}]   ;;  %s1936_s1 = inlined_call_operand.vmem [shape: s32[200,1], index: 1, kind: input, shape index: {}]   ;;  %s1937_s2 = inlined_call_operand.hbm [shape: f32[1,1,1], index: 2, kind: output, shape index: {}]  }
   0x1   :  { %v1211_v0 = vld [vmem:[%s1935_s0 + $0x10] sm:$0xff]  ;;  %v1216_v1 = vld [vmem:[%s1935_s0] sm:$0xff]  ;;  %v1221_v2 = vld [vmem:[%s1935_s0 + $0x18] sm:$0xff]  ;;  %1015 = vset.pattern.permute.xlu1 %v1190_v6  ;;  %1014 = vset.pattern.permute.xlu0 %v1190_v6 }
   0x2   :  { %v120_v3 = vsel %vm113_vm0, %v1211_v0, -inf  ;;  %v114_v4 = vsel %vm113_vm0, %v1216_v1, -inf  ;;  %v1230_v5 = vld [vmem:[%s1935_s0 + $0x8] sm:$0xff]  ;;  %v123_v7 = vsel %vm113_vm0, %v1221_v2, -inf  ;;  %v1244_v10 = vld [vmem:[%s1935_s0 + $0x20] sm:$0xff]  ;;  %v1253_v13 = vld [vmem:[%s1935_s0 + $0x38] sm:$0xff] }
   0x3   :  { %121 = vmax.xlane.f32.xlu1 %v120_v3  ;;  %115 = vmax.xlane.f32.xlu0 %v114_v4  ;;  %v117_v8 = vsel %vm113_vm0, %v1230_v5, -inf  ;;  %v1239_v9 = vld [vmem:[%s1935_s0 + $0x28] sm:$0xff]  ;;  %v126_v12 = vsel %vm113_vm0, %v1244_v10, -inf  ;;  %v1258_v14 = vld [vmem:[%s1935_s0 + $0x30] sm:$0xff]  ;;  %v135_v15 = vsel %vm113_vm0, %v1253_v13, -inf  ;;  %v1272_v18 = vld [vmem:[%s1935_s0 + $0x40] sm:$0xff] }
   0x4   :  { %v129_v11 = vsel %vm113_vm0, %v1239_v9, -inf  ;;  %v132_v16 = vsel %vm113_vm0, %v1258_v14, -inf  ;;  %v1267_v17 = vld [vmem:[%s1935_s0 + $0x48] sm:$0xff]  ;;  %v138_v20 = vsel %vm113_vm0, %v1272_v18, -inf  ;;  %v1281_v21 = vld [vmem:[%s1935_s0 + $0x58] sm:$0xff]  ;;  %v1286_v22 = vld [vmem:[%s1935_s0 + $0x50] sm:$0xff] }
   0x5   :  { %v141_v19 = vsel %vm113_vm0, %v1267_v17, -inf }
   0x7   :  { %124 = vmax.xlane.f32.xlu1 %v123_v7  ;;  %118 = vmax.xlane.f32.xlu0 %v117_v8 }
   0xb   :  { %130 = vmax.xlane.f32.xlu1 %v129_v11  ;;  %127 = vmax.xlane.f32.xlu0 %v126_v12 }
   0xf   :  { %136 = vmax.xlane.f32.xlu1 %v135_v15  ;;  %133 = vmax.xlane.f32.xlu0 %v132_v16 }
  0x10   :  { %7 = vsyncpa [#allocation3], 0  ;;  %v147_v23 = vsel %vm113_vm0, %v1281_v21, -inf  ;;  %v144_v24 = vsel %vm113_vm0, %v1286_v22, -inf  ;;  %v1295_v25 = vld [vmem:[%s1935_s0 + $0x68] sm:$0xff]  ;;  %v1300_v26 = vld [vmem:[%s1935_s0 + $0x60] sm:$0xff] }
  0x11   :  { %v153_v27 = vsel %vm113_vm0, %v1295_v25, -inf  ;;  %v150_v28 = vsel %vm113_vm0, %v1300_v26, -inf  ;;  %v1309_v29 = vld [vmem:[%s1935_s0 + $0x78] sm:$0xff]  ;;  %v1314_v30 = vld [vmem:[%s1935_s0 + $0x70] sm:$0xff]  ;;  %v1323_v33 = vld [vmem:[%s1935_s0 + $0x88] sm:$0xff] }
  0x12   :  { %v159_v31 = vsel %vm113_vm0, %v1309_v29, -inf  ;;  %v156_v32 = vsel %vm113_vm0, %v1314_v30, -inf  ;;  %v1328_v34 = vld [vmem:[%s1935_s0 + $0x80] sm:$0xff]  ;;  %v165_v35 = vsel %vm113_vm0, %v1323_v33, -inf  ;;  %v1337_v37 = vld [vmem:[%s1935_s0 + $0x90] sm:$0xff]  ;;  %v1342_v38 = vld [vmem:[%s1935_s0 + $0x98] sm:$0xff] }
  0x13   :  { %142 = vmax.xlane.f32.xlu1 %v141_v19  ;;  %139 = vmax.xlane.f32.xlu0 %v138_v20  ;;  %v162_v36 = vsel %vm113_vm0, %v1328_v34, -inf  ;;  %v168_v39 = vsel %vm113_vm0, %v1337_v37, -inf  ;;  %v171_v40 = vsel %vm113_vm0, %v1342_v38, -inf  ;;  %v1351_v41 = vld [vmem:[%s1935_s0 + $0xa0] sm:$0xff]  ;;  %v1356_v42 = vld [vmem:[%s1935_s0 + $0xa8] sm:$0xff]  ;;  %v1365_v45 = vld [vmem:[%s1935_s0 + $0xb0] sm:$0xff] }
  0x14   :  { %v174_v43 = vsel %vm113_vm0, %v1351_v41, -inf  ;;  %v177_v44 = vsel %vm113_vm0, %v1356_v42, -inf  ;;  %v1370_v46 = vld [vmem:[%s1935_s0 + $0xb8] sm:$0xff]  ;;  %v180_v47 = vsel %vm113_vm0, %v1365_v45, -inf  ;;  %v1379_v49 = vld [vmem:[%s1935_s0 + $0xc0] sm:$0xff]  ;;  %v89_v51 = vld [vmem:[%s1936_s1 + $0x8] sm:$0xff] }
  0x15   :  { %v183_v48 = vsel %vm113_vm0, %v1370_v46, -inf  ;;  %v186_v50 = vsel %vm113_vm0, %v1379_v49, -inf  ;;  %v88_v52 = vld [vmem:[%s1936_s1] sm:$0xff]  ;;  %v91_v53 = vld [vmem:[%s1936_s1 + $0x18] sm:$0xff]  ;;  %v90_v54 = vld [vmem:[%s1936_s1 + $0x10] sm:$0xff] }
  0x16   :  { %v93_v55 = vld [vmem:[%s1936_s1 + $0x28] sm:$0xff]  ;;  %v92_v56 = vld [vmem:[%s1936_s1 + $0x20] sm:$0xff]  ;;  %v95_v57 = vld [vmem:[%s1936_s1 + $0x38] sm:$0xff] }
  0x17   :  { %148 = vmax.xlane.f32.xlu1 %v147_v23  ;;  %145 = vmax.xlane.f32.xlu0 %v144_v24  ;;  %v94_v58 = vld [vmem:[%s1936_s1 + $0x30] sm:$0xff]  ;;  %v99_v59 = vld [vmem:[%s1936_s1 + $0x58] sm:$0xff]  ;;  %v96_v60 = vld [vmem:[%s1936_s1 + $0x40] sm:$0xff] }
  0x18   :  { %v104_v61 = vld [vmem:[%s1936_s1 + $0x80] sm:$0xff]  ;;  %v97_v62 = vld [vmem:[%s1936_s1 + $0x48] sm:$0xff]  ;;  %v106_v63 = vld [vmem:[%s1936_s1 + $0x90] sm:$0xff] }
  0x19   :  { %v98_v3 = vld [vmem:[%s1936_s1 + $0x50] sm:$0xff]  ;;  %v108_v4 = vld [vmem:[%s1936_s1 + $0xa0] sm:$0xff]  ;;  %v101_v8 = vld [vmem:[%s1936_s1 + $0x68] sm:$0xff] }
  0x1a   :  { %v100_v6 = vld [vmem:[%s1936_s1 + $0x60] sm:$0xff]  ;;  %v110_v7 = vld [vmem:[%s1936_s1 + $0xb0] sm:$0xff]  ;;  %v103_v15 = vld [vmem:[%s1936_s1 + $0x78] sm:$0xff] }
  0x1b   :  { %154 = vmax.xlane.f32.xlu1 %v153_v27  ;;  %151 = vmax.xlane.f32.xlu0 %v150_v28  ;;  %v112_v11 = vld [vmem:[%s1936_s1 + $0xc0] sm:$0xff]  ;;  %v102_v12 = vld [vmem:[%s1936_s1 + $0x70] sm:$0xff]  ;;  %v105_v16 = vld [vmem:[%s1936_s1 + $0x88] sm:$0xff] }
  0x1c   :  { %v107_v19 = vld [vmem:[%s1936_s1 + $0x98] sm:$0xff]  ;;  %v109_v20 = vld [vmem:[%s1936_s1 + $0xa8] sm:$0xff] }
  0x1d   :  { %v111_v23 = vld [vmem:[%s1936_s1 + $0xb8] sm:$0xff]  ;;  %s1192_s1 = smov [#allocation2]  }
  0x1e   :  { %s989_s23 = sshll.u32 %s1192_s1, 4  ;;  %s990_s23 = int_to_ptr.vmem [resolvable:$true] %s989_s23 }
  0x1f   :  { %160 = vmax.xlane.f32.xlu1 %v159_v31  ;;  %157 = vmax.xlane.f32.xlu0 %v156_v32  ;;  %s1166_s25 = scalar_lea.vmem %s990_s23, 16  ;;  %s1170_s26 = scalar_lea.vmem %s990_s23, 32 }
  0x20   :  { %p1167_p0 = scmp.ne.s32.totalorder %s990_s23, %s1166_s25  ;;  %p1171_p1 = scmp.lt.s32.totalorder %s990_s23, %s990_s23 }
  0x21   :  { %p1172_p2 = scmp.lt.s32.totalorder %s1170_s26, %s1166_s25 }
  0x23   :  { %166 = vmax.xlane.f32.xlu1 %v165_v35  ;;  %163 = vmax.xlane.f32.xlu0 %v162_v36  ;;  %p1173_p3 = por %p1172_p2, %p1171_p1 }
  0x25   :  { %p1174_p4 = pnand %p1173_p3, %p1167_p0 }
  0x27   :  { %169 = vmax.xlane.f32.xlu1 %v168_v39  ;;  %172 = vmax.xlane.f32.xlu0 %v171_v40 }
  0x2b   :  { %175 = vmax.xlane.f32.xlu1 %v174_v43  ;;  %178 = vmax.xlane.f32.xlu0 %v177_v44 }
  0x2f   :  { %181 = vmax.xlane.f32.xlu1 %v180_v47  ;;  %184 = vmax.xlane.f32.xlu0 %v183_v48 }
  0x33   :  { %187 = vmax.xlane.f32.xlu1 %v186_v50 }
  0x44   :  { %395 = vperm.xlu1 %1015, %v89_v51  }
  0x45   :  { %392 = vperm.xlu0 %1014, %v88_v52  }
  0x48   :  { %401 = vperm.xlu1 %1015, %v91_v53  }
  0x49   :  { %398 = vperm.xlu0 %1014, %v90_v54  }
  0x4c   :  { %407 = vperm.xlu1 %1015, %v93_v55  }
  0x4d   :  { %404 = vperm.xlu0 %1014, %v92_v56  }
  0x50   :  { %413 = vperm.xlu1 %1015, %v95_v57  }
  0x51   :  { %410 = vperm.xlu0 %1014, %v94_v58  }
  0x54   :  { %425 = vperm.xlu1 %1015, %v99_v59  }
  0x55   :  { %416 = vperm.xlu0 %1014, %v96_v60  }
  0x58   :  { %440 = vperm.xlu1 %1015, %v104_v61  }
  0x59   :  { %419 = vperm.xlu0 %1014, %v97_v62  }
  0x5c   :  { %446 = vperm.xlu1 %1015, %v106_v63  }
  0x5d   :  { %422 = vperm.xlu0 %1014, %v98_v3  }
  0x60   :  { %452 = vperm.xlu1 %1015, %v108_v4  }
  0x61   :  { %428 = vperm.xlu0 %1014, %v100_v6  }
  0x64   :  { %458 = vperm.xlu1 %1015, %v110_v7  }
  0x65   :  { %431 = vperm.xlu0 %1014, %v101_v8  }
  0x68   :  { %464 = vperm.xlu1 %1015, %v112_v11  }
  0x69   :  { %434 = vperm.xlu0 %1014, %v102_v12  }
  0x6d   :  { %437 = vperm.xlu0 %1014, %v103_v15  }
  0x71   :  { %443 = vperm.xlu0 %1014, %v105_v16  }
  0x75   :  { %449 = vperm.xlu0 %1014, %v107_v19  }
  0x79   :  { %455 = vperm.xlu0 %1014, %v109_v20  }
  0x7d   :  { %461 = vperm.xlu0 %1014, %v111_v23  }
  0x90   :  { %v122_v24 = vpop.xlane.xlu1 %121  ;;  %v116_v27 = vpop.xlane.xlu0 %115 }
  0x91   :  { %v1459_v28 = vsub.f32 %v1211_v0, %v122_v24  ;;  %v1462_v31 = vsub.f32 %v1216_v1, %v116_v27 }
  0x93   :  { %v214_v32 = vmul.f32 1.442695, %v1462_v31  ;;  %v218_v35 = vmul.f32 1.442695, %v1459_v28 }
  0x94   :  { %v125_v36 = vpop.xlane.xlu1 %124  ;;  %v119_v39 = vpop.xlane.xlu0 %118 }
  0x95   :  { %v1467_v40 = vsub.f32 %v1221_v2, %v125_v36  ;;  %v1470_v43 = vsub.f32 %v1230_v5, %v119_v39  ;;  %1016 = vpow2.f32 %v214_v32 }
  0x96   :  { %1018 = vpow2.f32 %v218_v35 }
  0x97   :  { %v216_v44 = vmul.f32 1.442695, %v1470_v43  ;;  %v220_v0 = vmul.f32 1.442695, %v1467_v40 }
  0x98   :  { %v131_v1 = vpop.xlane.xlu1 %130  ;;  %v128_v47 = vpop.xlane.xlu0 %127 }
  0x99   :  { %v1475_v48 = vsub.f32 %v1239_v9, %v131_v1  ;;  %v1478_v50 = vsub.f32 %v1244_v10, %v128_v47  ;;  %1020 = vpow2.f32 %v216_v44 }
  0x9a   :  { %1022 = vpow2.f32 %v220_v0 }
  0x9b   :  { %v222_v2 = vmul.f32 1.442695, %v1478_v50  ;;  %v224_v5 = vmul.f32 1.442695, %v1475_v48 }
  0x9c   :  { %v137_v51 = vpop.xlane.xlu1 %136  ;;  %v134_v52 = vpop.xlane.xlu0 %133 }
  0x9d   :  { %v1483_v53 = vsub.f32 %v1253_v13, %v137_v51  ;;  %v1486_v54 = vsub.f32 %v1258_v14, %v134_v52  ;;  %1024 = vpow2.f32 %v222_v2 }
  0x9e   :  { %1026 = vpow2.f32 %v224_v5  ;;  %v389_v5 = vlaneseq }
  0x9f   :  { %v226_v9 = vmul.f32 1.442695, %v1486_v54  ;;  %v1017_v55 = vpop.eup %1016  ;;  %v228_v10 = vmul.f32 1.442695, %v1483_v53 }
  0xa0   :  { %v143_v56 = vpop.xlane.xlu1 %142  ;;  %v140_v57 = vpop.xlane.xlu0 %139  ;;  %v264_v58 = vsel %vm113_vm0, %v1017_v55, 0.0  ;;  %v1532_v55 = vand.u32 127, %v389_v5 }
  0xa1   :  { %v1019_v59 = vpop.eup %1018  ;;  %1028 = vpow2.f32 %v226_v9  ;;  %265 = vadd.xlane.f32.xlu0 %v264_v58  ;;  %v1509_v39 = vsub.f32 %v1272_v18, %v140_v57  ;;  %v1514_v0 = vsub.f32 %v1267_v17, %v143_v56 }
  0xa2   :  { %1030 = vpow2.f32 %v228_v10  ;;  %v270_v14 = vsel %vm113_vm0, %v1019_v59, 0.0 }
  0xa3   :  { %v1021_v60 = vpop.eup %1020  ;;  %v230_v1 = vmul.f32 1.442695, %v1509_v39  ;;  %v232_v51 = vmul.f32 1.442695, %v1514_v0 }
  0xa4   :  { %v149_v13 = vpop.xlane.xlu1 %148  ;;  %v146_v61 = vpop.xlane.xlu0 %145  ;;  %v267_v62 = vsel %vm113_vm0, %v1021_v60, 0.0 }
  0xa5   :  { %v1023_v63 = vpop.eup %1022  ;;  %271 = vadd.xlane.f32.xlu0 %v270_v14  ;;  %268 = vadd.xlane.f32.xlu1 %v267_v62  ;;  %1032 = vpow2.f32 %v230_v1  ;;  %v1523_v52 = vsub.f32 %v1286_v22, %v146_v61  ;;  %v1530_v17 = vsub.f32 %v1281_v21, %v149_v13 }
  0xa6   :  { %v273_v7 = vsel %vm113_vm0, %v1023_v63, 0.0  ;;  %1034 = vpow2.f32 %v232_v51 }
  0xa7   :  { %v1025_v3 = vpop.eup %1024  ;;  %v234_v10 = vmul.f32 1.442695, %v1523_v52  ;;  %v236_v58 = vmul.f32 1.442695, %v1530_v17 }
  0xa8   :  { %v155_v4 = vpop.xlane.xlu1 %154  ;;  %v152_v6 = vpop.xlane.xlu0 %151  ;;  %v276_v8 = vsel %vm113_vm0, %v1025_v3, 0.0 }
  0xa9   :  { %v1027_v11 = vpop.eup %1026  ;;  %274 = vadd.xlane.f32.xlu0 %v273_v7  ;;  %277 = vadd.xlane.f32.xlu1 %v276_v8  ;;  %1036 = vpow2.f32 %v234_v10  ;;  %v1539_v22 = vsub.f32 %v1300_v26, %v152_v6  ;;  %v1548_v26 = vsub.f32 %v1295_v25, %v155_v4 }
  0xaa   :  { %v279_v19 = vsel %vm113_vm0, %v1027_v11, 0.0  ;;  %1038 = vpow2.f32 %v236_v58 }
  0xab   :  { %v1029_v12 = vpop.eup %1028  ;;  %v240_v11 = vmul.f32 1.442695, %v1548_v26 }
  0xac   :  { %v1495_v15 = vpop.xlane.xlu1 %160  ;;  %v158_v16 = vpop.xlane.xlu0 %157  ;;  %v282_v20 = vsel %vm113_vm0, %v1029_v12, 0.0 }
  0xad   :  { %v1031_v23 = vpop.eup %1030  ;;  %280 = vadd.xlane.f32.xlu0 %v279_v19  ;;  %283 = vadd.xlane.f32.xlu1 %v282_v20  ;;  %v1558_v25 = vsub.f32 %v1314_v30, %v158_v16 }
  0xae   :  { %v285_v32 = vsel %vm113_vm0, %v1031_v23, 0.0 }
  0xaf   :  { %v1033_v61 = vpop.eup %1032  ;;  %v242_v30 = vmul.f32 1.442695, %v1558_v25 }
  0xb0   :  { %v1499_v24 = vpop.xlane.xlu1 %166  ;;  %v1501_v27 = vpop.xlane.xlu0 %163  ;;  %v288_v63 = vsel %vm113_vm0, %v1033_v61, 0.0 }
  0xb1   :  { %286 = vadd.xlane.f32.xlu0 %v285_v32  ;;  %v1035_v6 = vpop.eup %1034 }
  0xb3   :  { %v1037_v19 = vpop.eup %1036 }
  0xb4   :  { %v1504_v35 = vpop.xlane.xlu1 %169  ;;  %v1506_v36 = vpop.xlane.xlu0 %172  ;;  %v294_v16 = vsel %vm113_vm0, %v1037_v19, 0.0 }
  0xb5   :  { %v1039_v1 = vpop.eup %1038 }
  0xb6   :  { %v297_v10 = vsel %vm113_vm0, %v1039_v1, 0.0 }
  0xb8   :  { %v1511_v44 = vpop.xlane.xlu1 %175  ;;  %v1517_v47 = vpop.xlane.xlu0 %178 }
  0xbc   :  { %v1519_v2 = vpop.xlane.xlu1 %181  ;;  %v1525_v18 = vpop.xlane.xlu0 %184 }
  0xbd   :  { %v1639_v1 = vsub.f32 %v1370_v46, %v1525_v18 }
  0xc0   :  { %v1527_v9 = vpop.xlane.xlu1 %187 }
  0xc4   :  { %v396_v56 = vpop.permute.xlu1 %395  ;;  %v393_v57 = vpop.permute.xlu0 %392 }
  0xc5   :  { %vm467_vm1 = vcmp.eq.s32.totalorder %v1532_v55, %v396_v56  ;;  %vm466_vm2 = vcmp.eq.s32.totalorder %v1532_v55, %v393_v57 }
  0xc6   :  { %v492_v21 = vsel %vm467_vm1, %v1470_v43, 0.0  ;;  %v491_v59 = vsel %vm466_vm2, %v1462_v31, 0.0  ;;  %v238_v43 = vmul.f32 1.442695, %v1539_v22 }
  0xc7   :  { %v519_v60 = vsel %vm113_vm0, %v492_v21, 0.0  ;;  %v516_v13 = vsel %vm113_vm0, %v491_v59, 0.0  ;;  %v1584_v21 = vsub.f32 %v1323_v33, %v1499_v24  ;;  %v1594_v33 = vsub.f32 %v1337_v37, %v1504_v35 }
  0xc8   :  { %v402_v14 = vpop.permute.xlu1 %401  ;;  %520 = vadd.xlane.f32.xlu0 %v519_v60  ;;  %517 = vadd.xlane.f32.xlu1 %v516_v13  ;;  %v399_v62 = vpop.permute.xlu0 %398  ;;  %1040 = vpow2.f32 %v238_v43 }
  0xc9   :  { %vm469_vm3 = vcmp.eq.s32.totalorder %v1532_v55, %v402_v14  ;;  %vm468_vm4 = vcmp.eq.s32.totalorder %v1532_v55, %v399_v62  ;;  %1042 = vpow2.f32 %v240_v11 }
  0xca   :  { %v493_v31 = vsel %vm468_vm4, %v1459_v28, 0.0  ;;  %v494_v8 = vsel %vm469_vm3, %v1467_v40, 0.0  ;;  %v291_v28 = vsel %vm113_vm0, %v1035_v6, 0.0  ;;  %v1566_v40 = vsub.f32 %v1309_v29, %v1495_v15 }
  0xcb   :  { %v522_v3 = vsel %vm113_vm0, %v493_v31, 0.0  ;;  %v525_v12 = vsel %vm113_vm0, %v494_v8, 0.0  ;;  %1044 = vpow2.f32 %v242_v30  ;;  %v1576_v29 = vsub.f32 %v1328_v34, %v1501_v27 }
  0xcc   :  { %289 = vadd.xlane.f32.xlu1 %v288_v63  ;;  %523 = vadd.xlane.f32.xlu0 %v522_v3  ;;  %v405_v7 = vpop.permute.xlu0 %404  ;;  %v408_v4 = vpop.permute.xlu1 %407  ;;  %v1603_v31 = vsub.f32 %v1342_v38, %v1506_v36 }
  0xcd   :  { %vm470_vm5 = vcmp.eq.s32.totalorder %v1532_v55, %v405_v7  ;;  %vm471_vm6 = vcmp.eq.s32.totalorder %v1532_v55, %v408_v4  ;;  %v246_v34 = vmul.f32 1.442695, %v1576_v29  ;;  %v1612_v7 = vsub.f32 %v1351_v41, %v1511_v44 }
  0xce   :  { %v495_v23 = vsel %vm470_vm5, %v1478_v50, 0.0  ;;  %v496_v51 = vsel %vm471_vm6, %v1475_v48, 0.0  ;;  %v244_v50 = vmul.f32 1.442695, %v1566_v40 }
  0xcf   :  { %v528_v32 = vsel %vm113_vm0, %v495_v23, 0.0  ;;  %v531_v56 = vsel %vm113_vm0, %v496_v51, 0.0  ;;  %v1630_v23 = vsub.f32 %v1365_v45, %v1519_v2 }
  0xd0   :  { %292 = vadd.xlane.f32.xlu1 %v291_v28  ;;  %526 = vadd.xlane.f32.xlu0 %v525_v12  ;;  %v411_v20 = vpop.permute.xlu0 %410  ;;  %v414_v15 = vpop.permute.xlu1 %413  ;;  %1046 = vpow2.f32 %v244_v50  ;;  %v1621_v28 = vsub.f32 %v1356_v42, %v1517_v47  ;;  %v1648_v50 = vsub.f32 %v1379_v49, %v1527_v9 }
  0xd1   :  { %vm472_vm7 = vcmp.eq.s32.totalorder %v1532_v55, %v411_v20  ;;  %vm473_vm8 = vcmp.eq.s32.totalorder %v1532_v55, %v414_v15  ;;  %1048 = vpow2.f32 %v246_v34 }
  0xd2   :  { %v1041_v57 = vpop.eup %1040  ;;  %v497_v48 = vsel %vm472_vm7, %v1486_v54, 0.0  ;;  %v498_v13 = vsel %vm473_vm8, %v1483_v53, 0.0  ;;  %v248_v54 = vmul.f32 1.442695, %v1584_v21  ;;  %v250_v53 = vmul.f32 1.442695, %v1594_v33 }
  0xd3   :  { %v300_v27 = vsel %vm113_vm0, %v1041_v57, 0.0  ;;  %v534_v59 = vsel %vm113_vm0, %v497_v48, 0.0  ;;  %v1043_v60 = vpop.eup %1042  ;;  %v537_v14 = vsel %vm113_vm0, %v498_v13, 0.0  ;;  %v262_v57 = vmul.f32 1.442695, %v1648_v50 }
  0xd4   :  { %295 = vadd.xlane.f32.xlu1 %v294_v16  ;;  %529 = vadd.xlane.f32.xlu0 %v528_v32  ;;  %v417_v5 = vpop.permute.xlu0 %416  ;;  %v303_v61 = vsel %vm113_vm0, %v1043_v60, 0.0  ;;  %1050 = vpow2.f32 %v248_v54  ;;  %v426_v38 = vpop.permute.xlu1 %425 }
  0xd5   :  { %vm474_vm9 = vcmp.eq.s32.totalorder %v1532_v55, %v417_v5  ;;  %v1045_v62 = vpop.eup %1044  ;;  %1052 = vpow2.f32 %v250_v53  ;;  %vm477_vm12 = vcmp.eq.s32.totalorder %v1532_v55, %v426_v38 }
  0xd6   :  { %v499_v43 = vsel %vm474_vm9, %v1509_v39, 0.0  ;;  %v306_v37 = vsel %vm113_vm0, %v1045_v62, 0.0  ;;  %v252_v39 = vmul.f32 1.442695, %v1603_v31  ;;  %v502_v20 = vsel %vm477_vm12, %v1530_v17, 0.0 }
  0xd7   :  { %v540_v35 = vsel %vm113_vm0, %v499_v43, 0.0  ;;  %v549_v47 = vsel %vm113_vm0, %v502_v20, 0.0  ;;  %v258_v17 = vmul.f32 1.442695, %v1630_v23 }
  0xd8   :  { %298 = vadd.xlane.f32.xlu1 %v297_v10  ;;  %532 = vadd.xlane.f32.xlu0 %v531_v56  ;;  %v420_v58 = vpop.permute.xlu0 %419  ;;  %1054 = vpow2.f32 %v252_v39  ;;  %v441_v46 = vpop.permute.xlu1 %440 }
  0xd9   :  { %vm475_vm10 = vcmp.eq.s32.totalorder %v1532_v55, %v420_v58  ;;  %vm482_vm2 = vcmp.eq.s32.totalorder %v1532_v55, %v441_v46 }
  0xda   :  { %v1047_v63 = vpop.eup %1046  ;;  %v500_v6 = vsel %vm475_vm10, %v1514_v0, 0.0  ;;  %v254_v0 = vmul.f32 1.442695, %v1612_v7  ;;  %v507_v13 = vsel %vm482_vm2, %v1576_v29, 0.0 }
  0xdb   :  { %v309_v36 = vsel %vm113_vm0, %v1047_v63, 0.0  ;;  %v543_v8 = vsel %vm113_vm0, %v500_v6, 0.0  ;;  %v1049_v11 = vpop.eup %1048 }
  0xdc   :  { %301 = vadd.xlane.f32.xlu1 %v300_v27  ;;  %535 = vadd.xlane.f32.xlu0 %v534_v59  ;;  %v423_v24 = vpop.permute.xlu0 %422  ;;  %v312_v44 = vsel %vm113_vm0, %v1049_v11, 0.0  ;;  %1056 = vpow2.f32 %v254_v0  ;;  %v447_v48 = vpop.permute.xlu1 %446 }
  0xdd   :  { %vm476_vm11 = vcmp.eq.s32.totalorder %v1532_v55, %v423_v24  ;;  %vm484_vm4 = vcmp.eq.s32.totalorder %v1532_v55, %v447_v48 }
  0xde   :  { %v501_v4 = vsel %vm476_vm11, %v1523_v52, 0.0  ;;  %v1051_v19 = vpop.eup %1050  ;;  %v256_v52 = vmul.f32 1.442695, %v1621_v28  ;;  %vm61_vm11 = vcmask 0  }
  0xdf   :  { %v546_v12 = vsel %vm113_vm0, %v501_v4, 0.0  ;;  %v315_v42 = vsel %vm113_vm0, %v1051_v19, 0.0  ;;  %v1053_v30 = vpop.eup %1052 }
  0xe0   :  { %304 = vadd.xlane.f32.xlu1 %v303_v61  ;;  %538 = vadd.xlane.f32.xlu0 %v537_v14  ;;  %v429_v3 = vpop.permute.xlu0 %428  ;;  %1058 = vpow2.f32 %v256_v52  ;;  %v318_v45 = vsel %vm113_vm0, %v1053_v30, 0.0  ;;  %v453_v54 = vpop.permute.xlu1 %452 }
  0xe1   :  { %vm478_vm13 = vcmp.eq.s32.totalorder %v1532_v55, %v429_v3  ;;  %1060 = vpow2.f32 %v258_v17  ;;  %vm486_vm5 = vcmp.eq.s32.totalorder %v1532_v55, %v453_v54 }
  0xe2   :  { %v503_v32 = vsel %vm478_vm13, %v1539_v22, 0.0  ;;  %v1055_v5 = vpop.eup %1054  ;;  %v260_v22 = vmul.f32 1.442695, %v1639_v1  ;;  %v511_v6 = vsel %vm486_vm5, %v1612_v7, 0.0 }
  0xe3   :  { %v552_v2 = vsel %vm113_vm0, %v503_v32, 0.0  ;;  %v321_v15 = vsel %vm113_vm0, %v1055_v5, 0.0 }
  0xe4   :  { %307 = vadd.xlane.f32.xlu1 %v306_v37  ;;  %541 = vadd.xlane.f32.xlu0 %v540_v35  ;;  %v432_v41 = vpop.permute.xlu0 %431  ;;  %1062 = vpow2.f32 %v260_v22  ;;  %v509_v37 = vsel %vm484_vm4, %v1594_v33, 0.0  ;;  %v459_v35 = vpop.permute.xlu1 %458 }
  0xe5   :  { %vm479_vm14 = vcmp.eq.s32.totalorder %v1532_v55, %v432_v41  ;;  %1064 = vpow2.f32 %v262_v57  ;;  %vm488_vm7 = vcmp.eq.s32.totalorder %v1532_v55, %v459_v35 }
  0xe6   :  { %v504_v51 = vsel %vm479_vm14, %v1548_v26, 0.0  ;;  %v1057_v56 = vpop.eup %1056  ;;  %v513_v11 = vsel %vm488_vm7, %v1630_v23, 0.0 }
  0xe7   :  { %v555_v10 = vsel %vm113_vm0, %v504_v51, 0.0  ;;  %v324_v58 = vsel %vm113_vm0, %v1057_v56, 0.0 }
  0xe8   :  { %310 = vadd.xlane.f32.xlu1 %v309_v36  ;;  %544 = vadd.xlane.f32.xlu0 %v543_v8  ;;  %v435_v16 = vpop.permute.xlu0 %434  ;;  %v465_v33 = vpop.permute.xlu1 %464  ;;  %v576_v36 = vsel %vm113_vm0, %v511_v6, 0.0 }
  0xe9   :  { %vm480_vm15 = vcmp.eq.s32.totalorder %v1532_v55, %v435_v16  ;;  %vm490_vm9 = vcmp.eq.s32.totalorder %v1532_v55, %v465_v33 }
  0xea   :  { %v505_v26 = vsel %vm480_vm15, %v1558_v25, 0.0  ;;  %v1059_v9 = vpop.eup %1058  ;;  %v515_v0 = vsel %vm490_vm9, %v1648_v50, 0.0 }
  0xeb   :  { %v558_v49 = vsel %vm113_vm0, %v505_v26, 0.0  ;;  %v327_v25 = vsel %vm113_vm0, %v1059_v9, 0.0  ;;  %v1061_v60 = vpop.eup %1060 }
  0xec   :  { %313 = vadd.xlane.f32.xlu1 %v312_v44  ;;  %547 = vadd.xlane.f32.xlu0 %v546_v12  ;;  %v438_v18 = vpop.permute.xlu0 %437  ;;  %v330_v61 = vsel %vm113_vm0, %v1061_v60, 0.0  ;;  %v588_v44 = vsel %vm113_vm0, %v515_v0, 0.0 }
  0xed   :  { %vm481_vm1 = vcmp.eq.s32.totalorder %v1532_v55, %v438_v18 }
  0xee   :  { %v506_v27 = vsel %vm481_vm1, %v1566_v40, 0.0  ;;  %v564_v40 = vsel %vm113_vm0, %v507_v13, 0.0  ;;  %v1063_v14 = vpop.eup %1062 }
  0xef   :  { %v561_v59 = vsel %vm113_vm0, %v506_v27, 0.0  ;;  %v333_v43 = vsel %vm113_vm0, %v1063_v14, 0.0  ;;  %v1065_v29 = vpop.eup %1064 }
  0xf0   :  { %316 = vadd.xlane.f32.xlu1 %v315_v42  ;;  %550 = vadd.xlane.f32.xlu0 %v549_v47  ;;  %v444_v34 = vpop.permute.xlu0 %443  ;;  %v336_v3 = vsel %vm113_vm0, %v1065_v29, 0.0 }
  0xf1   :  { %vm483_vm3 = vcmp.eq.s32.totalorder %v1532_v55, %v444_v34 }
  0xf2   :  { %v508_v62 = vsel %vm483_vm3, %v1584_v21, 0.0  ;;  %v570_v21 = vsel %vm113_vm0, %v509_v37, 0.0 }
  0xf3   :  { %v567_v53 = vsel %vm113_vm0, %v508_v62, 0.0 }
  0xf4   :  { %319 = vadd.xlane.f32.xlu1 %v318_v45  ;;  %553 = vadd.xlane.f32.xlu0 %v552_v2  ;;  %v450_v24 = vpop.permute.xlu0 %449 }
  0xf5   :  { %vm485_vm6 = vcmp.eq.s32.totalorder %v1532_v55, %v450_v24 }
  0xf6   :  { %v510_v39 = vsel %vm485_vm6, %v1603_v31, 0.0  ;;  %v582_v31 = vsel %vm113_vm0, %v513_v11, 0.0 }
  0xf7   :  { %v573_v8 = vsel %vm113_vm0, %v510_v39, 0.0 }
  0xf8   :  { %322 = vadd.xlane.f32.xlu1 %v321_v15  ;;  %556 = vadd.xlane.f32.xlu0 %v555_v10  ;;  %v456_v63 = vpop.permute.xlu0 %455 }
  0xf9   :  { %vm487_vm8 = vcmp.eq.s32.totalorder %v1532_v55, %v456_v63 }
  0xfa   :  { %v512_v7 = vsel %vm487_vm8, %v1621_v28, 0.0 }
  0xfb   :  { %v579_v4 = vsel %vm113_vm0, %v512_v7, 0.0 }
  0xfc   :  { %325 = vadd.xlane.f32.xlu1 %v324_v58  ;;  %559 = vadd.xlane.f32.xlu0 %v558_v49  ;;  %v462_v38 = vpop.permute.xlu0 %461 }
  0xfd   :  { %vm489_vm10 = vcmp.eq.s32.totalorder %v1532_v55, %v462_v38 }
  0xfe   :  { %v514_v41 = vsel %vm489_vm10, %v1639_v1, 0.0 }
  0xff   :  { %v585_v12 = vsel %vm113_vm0, %v514_v41, 0.0  ;;  %vm920_vm0 = vcmask 7168  }
 0x100   :  { %328 = vadd.xlane.f32.xlu1 %v327_v25  ;;  %562 = vadd.xlane.f32.xlu0 %v561_v59 }
 0x104   :  { %331 = vadd.xlane.f32.xlu1 %v330_v61  ;;  %565 = vadd.xlane.f32.xlu0 %v564_v40 }
 0x108   :  { %334 = vadd.xlane.f32.xlu1 %v333_v43  ;;  %568 = vadd.xlane.f32.xlu0 %v567_v53 }
 0x10c   :  { %337 = vadd.xlane.f32.xlu1 %v336_v3  ;;  %571 = vadd.xlane.f32.xlu0 %v570_v21 }
 0x110   :  { %577 = vadd.xlane.f32.xlu0 %v576_v36  ;;  %574 = vadd.xlane.f32.xlu1 %v573_v8 }
 0x114   :  { %583 = vadd.xlane.f32.xlu0 %v582_v31  ;;  %580 = vadd.xlane.f32.xlu1 %v579_v4 }
 0x118   :  { %589 = vadd.xlane.f32.xlu0 %v588_v44  ;;  %586 = vadd.xlane.f32.xlu1 %v585_v12 }
 0x12e   :  { %v266_v28 = vpop.xlane.xlu0 %265 }
 0x12f   :  { %1066 = vlog2.f32 %v266_v28 }
 0x132   :  { %v272_v19 = vpop.xlane.xlu0 %271  ;;  %v269_v20 = vpop.xlane.xlu1 %268 }
 0x133   :  { %1068 = vlog2.f32 %v269_v20 }
 0x134   :  { %1070 = vlog2.f32 %v272_v19 }
 0x136   :  { %v275_v55 = vpop.xlane.xlu0 %274  ;;  %v278_v52 = vpop.xlane.xlu1 %277 }
 0x137   :  { %1072 = vlog2.f32 %v275_v55 }
 0x138   :  { %1074 = vlog2.f32 %v278_v52 }
 0x139   :  { %v1067_v30 = vpop.eup %1066 }
 0x13a   :  { %v281_v23 = vpop.xlane.xlu0 %280  ;;  %v284_v42 = vpop.xlane.xlu1 %283  ;;  %v1694_v1 = vmul.f32 0.6931472, %v1067_v30 }
 0x13b   :  { %1076 = vlog2.f32 %v281_v23 }
 0x13c   :  { %1078 = vlog2.f32 %v284_v42 }
 0x13d   :  { %v1069_v17 = vpop.eup %1068 }
 0x13e   :  { %v287_v47 = vpop.xlane.xlu0 %286  ;;  %v1071_v45 = vpop.eup %1070  ;;  %v1696_v2 = vmul.f32 0.6931472, %v1069_v17 }
 0x13f   :  { %v1704_v18 = vmul.f32 0.6931472, %v1071_v45  ;;  %1080 = vlog2.f32 %v287_v47 }
 0x141   :  { %v1073_v46 = vpop.eup %1072 }
 0x142   :  { %v1075_v57 = vpop.eup %1074  ;;  %v1710_v58 = vmul.f32 0.6931472, %v1073_v46 }
 0x143   :  { %v1716_v27 = vmul.f32 0.6931472, %v1075_v57 }
 0x145   :  { %v1077_v59 = vpop.eup %1076 }
 0x146   :  { %v1079_v61 = vpop.eup %1078  ;;  %v1722_v40 = vmul.f32 0.6931472, %v1077_v59 }
 0x147   :  { %v1724_v62 = vmul.f32 0.6931472, %v1079_v61 }
 0x149   :  { %v1081_v37 = vpop.eup %1080 }
 0x14a   :  { %v1734_v38 = vmul.f32 0.6931472, %v1081_v37 }
 0x155   :  { %v1690_v16 = vpop.xlane.xlu1 %517  ;;  %v1692_v32 = vpop.xlane.xlu0 %520 }
 0x156   :  { %v616_v22 = vsub.f32 %v1690_v16, %v1694_v1  ;;  %v617_v50 = vsub.f32 %v1692_v32, %v1696_v2 }
 0x158   :  { %v641_v56 = vmul.f32 1.442695, %v616_v22  ;;  %v643_v49 = vmul.f32 1.442695, %v617_v50 }
 0x159   :  { %v290_v5 = vpop.xlane.xlu1 %289  ;;  %v1698_v51 = vpop.xlane.xlu0 %523 }
 0x15a   :  { %v618_v26 = vsub.f32 %v1698_v51, %v1704_v18  ;;  %1082 = vpow2.f32 %v641_v56 }
 0x15b   :  { %1084 = vpow2.f32 %v643_v49 }
 0x15c   :  { %v645_v25 = vmul.f32 1.442695, %v618_v26  ;;  %1086 = vlog2.f32 %v290_v5 }
 0x15d   :  { %v293_v15 = vpop.xlane.xlu1 %292  ;;  %v1706_v10 = vpop.xlane.xlu0 %526 }
 0x15e   :  { %v619_v9 = vsub.f32 %v1706_v10, %v1710_v58  ;;  %1088 = vpow2.f32 %v645_v25 }
 0x15f   :  { %1090 = vlog2.f32 %v293_v15 }
 0x160   :  { %v647_v13 = vmul.f32 1.442695, %v619_v9 }
 0x161   :  { %v296_v48 = vpop.xlane.xlu1 %295  ;;  %v1714_v34 = vpop.xlane.xlu0 %529 }
 0x162   :  { %v620_v60 = vsub.f32 %v1714_v34, %v1716_v27  ;;  %1092 = vpow2.f32 %v647_v13 }
 0x163   :  { %1094 = vlog2.f32 %v296_v48 }
 0x164   :  { %v649_v14 = vmul.f32 1.442695, %v620_v60  ;;  %v1083_v63 = vpop.eup %1082 }
 0x165   :  { %v299_v54 = vpop.xlane.xlu1 %298  ;;  %v1720_v24 = vpop.xlane.xlu0 %532  ;;  %v691_v31 = vsub.f32 1.0, %v1083_v63 }
 0x166   :  { %v621_v43 = vsub.f32 %v1720_v24, %v1722_v40  ;;  %1096 = vpow2.f32 %v649_v14  ;;  %v1085_v3 = vpop.eup %1084 }
 0x167   :  { %v1087_v33 = vpop.eup %1086  ;;  %1098 = vlog2.f32 %v299_v54  ;;  %v692_v4 = vsub.f32 1.0, %v1085_v3  ;;  %v716_v23 = vmax.f32 %v691_v31, 0.0 }
 0x168   :  { %v651_v21 = vmul.f32 1.442695, %v621_v43  ;;  %v1089_v8 = vpop.eup %1088  ;;  %v1738_v0 = vmul.f32 0.6931472, %v1087_v33 }
 0x169   :  { %v302_v53 = vpop.xlane.xlu1 %301  ;;  %v1728_v29 = vpop.xlane.xlu0 %535  ;;  %v693_v20 = vsub.f32 1.0, %v1089_v8  ;;  %v717_v42 = vmax.f32 %v692_v4, 0.0  ;;  %v741_v26 = vmul.f32 %v716_v23, %v716_v23 }
 0x16a   :  { %v622_v35 = vsub.f32 %v1728_v29, %v1724_v62  ;;  %v1091_v7 = vpop.eup %1090  ;;  %1100 = vpow2.f32 %v651_v21  ;;  %v591_v21 = vsub.f32 %v1694_v1, %v1690_v16 }
 0x16b   :  { %v1744_v55 = vmul.f32 0.6931472, %v1091_v7  ;;  %v718_v50 = vmax.f32 %v693_v20, 0.0  ;;  %v742_v57 = vmul.f32 %v717_v42, %v717_v42  ;;  %v766_v43 = vmul.f32 0.25, %v741_v26 }
 0x16c   :  { %v653_v36 = vmul.f32 1.442695, %v622_v35  ;;  %v1093_v28 = vpop.eup %1092  ;;  %v593_v7 = vsub.f32 %v1704_v18, %v1698_v51 }
 0x16d   :  { %v305_v6 = vpop.xlane.xlu1 %304  ;;  %v1732_v39 = vpop.xlane.xlu0 %538  ;;  %v694_v5 = vsub.f32 1.0, %v1093_v28  ;;  %v743_v54 = vmul.f32 %v718_v50, %v718_v50 }
 0x16e   :  { %v623_v11 = vsub.f32 %v1732_v39, %v1734_v38  ;;  %1102 = vpow2.f32 %v653_v36  ;;  %v1095_v52 = vpop.eup %1094 }
 0x16f   :  { %1104 = vlog2.f32 %v302_v53  ;;  %v1750_v46 = vmul.f32 0.6931472, %v1095_v52  ;;  %v719_v25 = vmax.f32 %v694_v5, 0.0  ;;  %v767_v53 = vmul.f32 0.25, %v742_v57 }
 0x170   :  { %v655_v12 = vmul.f32 1.442695, %v623_v11  ;;  %v1097_v45 = vpop.eup %1096  ;;  %v592_v11 = vsub.f32 %v1696_v2, %v1692_v32  ;;  %v768_v4 = vmul.f32 0.25, %v743_v54  ;;  %v597_v5 = vsub.f32 %v1724_v62, %v1728_v29 }
 0x171   :  { %v308_v41 = vpop.xlane.xlu1 %307  ;;  %v1740_v44 = vpop.xlane.xlu0 %541  ;;  %v695_v49 = vsub.f32 1.0, %v1097_v45  ;;  %v596_v45 = vsub.f32 %v1722_v40, %v1720_v24 }
 0x172   :  { %v624_v19 = vsub.f32 %v1740_v44, %v1738_v0  ;;  %1106 = vpow2.f32 %v655_v12  ;;  %v1099_v56 = vpop.eup %1098  ;;  %v791_v12 = vmul.f32 %v766_v43, %v591_v21  ;;  %v792_v28 = vmul.f32 %v767_v53, %v592_v11 }
 0x173   :  { %v1756_v61 = vmul.f32 0.6931472, %v1099_v56  ;;  %v720_v37 = vmax.f32 %v695_v49, 0.0  ;;  %v599_v53 = vsub.f32 %v1738_v0, %v1740_v44 }
 0x174   :  { %v657_v47 = vmul.f32 1.442695, %v624_v19  ;;  %v1101_v60 = vpop.eup %1100  ;;  %v921_v50 = vsel %vm920_vm0, %v791_v12, 0.0 }
 0x175   :  { %v311_v30 = vpop.xlane.xlu1 %310  ;;  %v1746_v17 = vpop.xlane.xlu0 %544  ;;  %v696_v33 = vsub.f32 1.0, %v1101_v60  ;;  %v745_v19 = vmul.f32 %v720_v37, %v720_v37  ;;  %v598_v60 = vsub.f32 %v1734_v38, %v1732_v39 }
 0x176   :  { %v625_v22 = vsub.f32 %v1746_v17, %v1744_v55  ;;  %1108 = vpow2.f32 %v657_v47 }
 0x177   :  { %1110 = vlog2.f32 %v305_v6  ;;  %v744_v6 = vmul.f32 %v719_v25, %v719_v25  ;;  %v721_v51 = vmax.f32 %v696_v33, 0.0 }
 0x178   :  { %v659_v15 = vmul.f32 1.442695, %v625_v22  ;;  %v1103_v13 = vpop.eup %1102 }
 0x179   :  { %v314_v9 = vpop.xlane.xlu1 %313  ;;  %v1752_v48 = vpop.xlane.xlu0 %547  ;;  %v697_v31 = vsub.f32 1.0, %v1103_v13  ;;  %v769_v2 = vmul.f32 0.25, %v744_v6 }
 0x17a   :  { %v626_v59 = vsub.f32 %v1752_v48, %v1750_v46  ;;  %1112 = vpow2.f32 %v659_v15  ;;  %v1105_v3 = vpop.eup %1104  ;;  %v770_v15 = vmul.f32 0.25, %v745_v19 }
 0x17b   :  { %1114 = vlog2.f32 %v308_v41  ;;  %v594_v41 = vsub.f32 %v1710_v58, %v1706_v10  ;;  %v1770_v20 = vmul.f32 0.6931472, %v1105_v3  ;;  %v722_v42 = vmax.f32 %v697_v31, 0.0 }
 0x17c   :  { %v661_v14 = vmul.f32 1.442695, %v626_v59  ;;  %v1107_v8 = vpop.eup %1106  ;;  %1116 = vlog2.f32 %v311_v30  ;;  %v793_v58 = vmul.f32 %v768_v4, %v593_v7  ;;  %v595_v30 = vsub.f32 %v1716_v27, %v1714_v34 }
 0x17d   :  { %v317_v35 = vpop.xlane.xlu1 %316  ;;  %v1758_v63 = vpop.xlane.xlu0 %550  ;;  %v698_v18 = vsub.f32 1.0, %v1107_v8  ;;  %v794_v25 = vmul.f32 %v769_v2, %v594_v41  ;;  %v746_v34 = vmul.f32 %v721_v51, %v721_v51  ;;  %v747_v24 = vmul.f32 %v722_v42, %v722_v42 }
 0x17e   :  { %v627_v36 = vsub.f32 %v1758_v63, %v1756_v61  ;;  %1118 = vpow2.f32 %v661_v14  ;;  %v924_v29 = vsel %vm920_vm0, %v793_v58, 0.0  ;;  %v795_v43 = vmul.f32 %v770_v15, %v595_v30 }
 0x17f   :  { %1120 = vlog2.f32 %v314_v9  ;;  %v922_v9 = vsel %vm920_vm0, %v792_v28, 0.0  ;;  %v723_v27 = vmax.f32 %v698_v18, 0.0  ;;  %v926_v33 = vsel %vm920_vm0, %v794_v25, 0.0 }
 0x180   :  { %v663_v16 = vmul.f32 1.442695, %v627_v36  ;;  %v1109_v1 = vpop.eup %1108  ;;  %v923_v14 = vadd.f32 %v922_v9, %v921_v50  ;;  %v771_v36 = vmul.f32 0.25, %v746_v34  ;;  %v772_v38 = vmul.f32 0.25, %v747_v24 }
 0x181   :  { %v320_v52 = vpop.xlane.xlu1 %319  ;;  %v1772_v23 = vpop.xlane.xlu0 %553  ;;  %v699_v47 = vsub.f32 1.0, %v1109_v1  ;;  %v748_v8 = vmul.f32 %v723_v27, %v723_v27  ;;  %v600_v31 = vsub.f32 %v1744_v55, %v1746_v17  ;;  %v601_v30 = vsub.f32 %v1750_v46, %v1752_v48 }
 0x182   :  { %v1111_v32 = vpop.eup %1110  ;;  %1122 = vpow2.f32 %v663_v16  ;;  %v628_v10 = vsub.f32 %v1772_v23, %v1770_v20  ;;  %v925_v39 = vadd.f32 %v924_v29, %v923_v14  ;;  %v928_v16 = vsel %vm920_vm0, %v795_v43, 0.0 }
 0x183   :  { %v1783_v56 = vmul.f32 0.6931472, %v1111_v32  ;;  %v724_v40 = vmax.f32 %v699_v47, 0.0  ;;  %v796_v32 = vmul.f32 %v771_v36, %v596_v45  ;;  %v773_v2 = vmul.f32 0.25, %v748_v8 }
 0x184   :  { %v1113_v22 = vpop.eup %1112  ;;  %v665_v26 = vmul.f32 1.442695, %v628_v10  ;;  %v927_v41 = vadd.f32 %v926_v33, %v925_v39  ;;  %v797_v55 = vmul.f32 %v772_v38, %v597_v5 }
 0x185   :  { %v323_v57 = vpop.xlane.xlu1 %322  ;;  %v1785_v49 = vpop.xlane.xlu0 %556  ;;  %v700_v13 = vsub.f32 1.0, %v1113_v22 }
 0x186   :  { %v1115_v59 = vpop.eup %1114  ;;  %1124 = vpow2.f32 %v665_v26  ;;  %v629_v62 = vsub.f32 %v1785_v49, %v1783_v56  ;;  %v929_v58 = vadd.f32 %v928_v16, %v927_v41  ;;  %v930_v26 = vsel %vm920_vm0, %v796_v32, 0.0 }
 0x187   :  { %1126 = vlog2.f32 %v317_v35  ;;  %v1117_v54 = vpop.eup %1116  ;;  %v1798_v11 = vmul.f32 0.6931472, %v1115_v59  ;;  %v749_v35 = vmul.f32 %v724_v40, %v724_v40  ;;  %v725_v0 = vmax.f32 %v700_v13, 0.0 }
 0x188   :  { %v667_v37 = vmul.f32 1.442695, %v629_v62  ;;  %v1119_v6 = vpop.eup %1118  ;;  %v1805_v1 = vmul.f32 0.6931472, %v1117_v54  ;;  %v932_v34 = vsel %vm920_vm0, %v797_v55, 0.0  ;;  %v602_v59 = vsub.f32 %v1756_v61, %v1758_v63 }
 0x189   :  { %v326_v3 = vpop.xlane.xlu1 %325  ;;  %v1795_v21 = vpop.xlane.xlu0 %559  ;;  %v701_v12 = vsub.f32 1.0, %v1119_v6  ;;  %v774_v17 = vmul.f32 0.25, %v749_v35  ;;  %v750_v18 = vmul.f32 %v725_v0, %v725_v0  ;;  %v931_v62 = vadd.f32 %v930_v26, %v929_v58 }
 0x18a   :  { %1128 = vpow2.f32 %v667_v37  ;;  %v1121_v7 = vpop.eup %1120  ;;  %v630_v44 = vsub.f32 %v1795_v21, %v1798_v11  ;;  %v603_v6 = vsub.f32 %v1770_v20, %v1772_v23  ;;  %v605_v32 = vsub.f32 %v1798_v11, %v1795_v21 }
 0x18b   :  { %1130 = vlog2.f32 %v320_v52  ;;  %v1811_v42 = vmul.f32 0.6931472, %v1121_v7  ;;  %v726_v45 = vmax.f32 %v701_v12, 0.0  ;;  %v799_v27 = vmul.f32 %v774_v17, %v599_v53 }
 0x18c   :  { %v1123_v4 = vpop.eup %1122  ;;  %1132 = vlog2.f32 %v323_v57  ;;  %v669_v51 = vmul.f32 1.442695, %v630_v44  ;;  %v798_v57 = vmul.f32 %v773_v2, %v598_v60  ;;  %v775_v46 = vmul.f32 0.25, %v750_v18 }
 0x18d   :  { %v329_v28 = vpop.xlane.xlu1 %328  ;;  %v1807_v19 = vpop.xlane.xlu0 %562  ;;  %1134 = vlog2.f32 %v326_v3  ;;  %v702_v47 = vsub.f32 1.0, %v1123_v4  ;;  %v751_v29 = vmul.f32 %v726_v45, %v726_v45  ;;  %v933_v3 = vadd.f32 %v932_v34, %v931_v62 }
 0x18e   :  { %v631_v52 = vsub.f32 %v1807_v19, %v1805_v1  ;;  %1136 = vpow2.f32 %v669_v51  ;;  %v934_v43 = vsel %vm920_vm0, %v798_v57, 0.0  ;;  %v936_v8 = vsel %vm920_vm0, %v799_v27, 0.0 }
 0x18f   :  { %v727_v48 = vmax.f32 %v702_v47, 0.0  ;;  %v800_v39 = vmul.f32 %v775_v46, %v600_v31  ;;  %v935_v0 = vadd.f32 %v934_v43, %v933_v3  ;;  %v776_v44 = vmul.f32 0.25, %v751_v29 }
 0x190   :  { %v1125_v10 = vpop.eup %1124  ;;  %v671_v22 = vmul.f32 1.442695, %v631_v52  ;;  %v606_v26 = vsub.f32 %v1805_v1, %v1807_v19 }
 0x191   :  { %v332_v50 = vpop.xlane.xlu1 %331  ;;  %v1815_v15 = vpop.xlane.xlu0 %565  ;;  %v703_v9 = vsub.f32 1.0, %v1125_v10  ;;  %v752_v38 = vmul.f32 %v727_v48, %v727_v48  ;;  %v937_v31 = vadd.f32 %v936_v8, %v935_v0  ;;  %v938_v55 = vsel %vm920_vm0, %v800_v39, 0.0 }
 0x192   :  { %v1127_v5 = vpop.eup %1126  ;;  %v632_v25 = vsub.f32 %v1815_v15, %v1811_v42  ;;  %1138 = vpow2.f32 %v671_v22  ;;  %v801_v10 = vmul.f32 %v776_v44, %v601_v30 }
 0x193   :  { %1140 = vlog2.f32 %v329_v28  ;;  %v1823_v13 = vmul.f32 0.6931472, %v1127_v5  ;;  %v728_v53 = vmax.f32 %v703_v9, 0.0  ;;  %v604_v28 = vsub.f32 %v1783_v56, %v1785_v49 }
 0x194   :  { %v673_v24 = vmul.f32 1.442695, %v632_v25  ;;  %v1129_v40 = vpop.eup %1128  ;;  %1142 = vlog2.f32 %v332_v50  ;;  %v777_v17 = vmul.f32 0.25, %v752_v38  ;;  %v939_v34 = vadd.f32 %v938_v55, %v937_v31 }
 0x195   :  { %v335_v60 = vpop.xlane.xlu1 %334  ;;  %v1825_v54 = vpop.xlane.xlu0 %568  ;;  %v704_v37 = vsub.f32 1.0, %v1129_v40  ;;  %v753_v23 = vmul.f32 %v728_v53, %v728_v53  ;;  %v940_v19 = vsel %vm920_vm0, %v801_v10, 0.0 }
 0x196   :  { %v1131_v14 = vpop.eup %1130  ;;  %1144 = vpow2.f32 %v673_v24  ;;  %v633_v33 = vsub.f32 %v1825_v54, %v1823_v13  ;;  %v802_v48 = vmul.f32 %v777_v17, %v602_v59 }
 0x197   :  { %1146 = vlog2.f32 %v335_v60  ;;  %v1133_v36 = vpop.eup %1132  ;;  %v729_v35 = vmax.f32 %v704_v37, 0.0  ;;  %v1833_v4 = vmul.f32 0.6931472, %v1131_v14  ;;  %v778_v5 = vmul.f32 0.25, %v753_v23 }
 0x198   :  { %v1135_v7 = vpop.eup %1134  ;;  %v675_v41 = vmul.f32 1.442695, %v633_v33  ;;  %v1844_v52 = vmul.f32 0.6931472, %v1133_v36  ;;  %v942_v8 = vsel %vm920_vm0, %v802_v48, 0.0 }
 0x199   :  { %v338_v16 = vpop.xlane.xlu1 %337  ;;  %v1835_v12 = vpop.xlane.xlu0 %571  ;;  %v754_v18 = vmul.f32 %v729_v35, %v729_v35  ;;  %v1846_v58 = vmul.f32 0.6931472, %v1135_v7  ;;  %v803_v37 = vmul.f32 %v778_v5, %v603_v6 }
 0x19a   :  { %v1137_v20 = vpop.eup %1136  ;;  %1148 = vlog2.f32 %v338_v16  ;;  %v634_v51 = vsub.f32 %v1835_v12, %v1833_v4 }
 0x19b   :  { %v705_v2 = vsub.f32 1.0, %v1137_v20  ;;  %1150 = vpow2.f32 %v675_v41  ;;  %v779_v24 = vmul.f32 0.25, %v754_v18  ;;  %v941_v20 = vadd.f32 %v940_v19, %v939_v34 }
 0x19c   :  { %v1139_v47 = vpop.eup %1138  ;;  %v677_v49 = vmul.f32 1.442695, %v634_v51  ;;  %v944_v23 = vsel %vm920_vm0, %v803_v37, 0.0 }
 0x19d   :  { %v730_v56 = vmax.f32 %v705_v2, 0.0  ;;  %v1848_v45 = vpop.xlane.xlu1 %574  ;;  %v1850_v22 = vpop.xlane.xlu0 %577  ;;  %v706_v57 = vsub.f32 1.0, %v1139_v47  ;;  %v804_v39 = vmul.f32 %v779_v24, %v604_v28  ;;  %v943_v18 = vadd.f32 %v942_v8, %v941_v20 }
 0x19e   :  { %v1141_v50 = vpop.eup %1140  ;;  %v635_v9 = vsub.f32 %v1848_v45, %v1844_v52  ;;  %1152 = vpow2.f32 %v677_v49  ;;  %v636_v27 = vsub.f32 %v1850_v22, %v1846_v58  ;;  %v607_v47 = vsub.f32 %v1811_v42, %v1815_v15 }
 0x19f   :  { %v1143_v25 = vpop.eup %1142  ;;  %v755_v30 = vmul.f32 %v730_v56, %v730_v56  ;;  %v731_v40 = vmax.f32 %v706_v57, 0.0  ;;  %v1862_v29 = vmul.f32 0.6931472, %v1141_v50  ;;  %v946_v49 = vsel %vm920_vm0, %v804_v39, 0.0 }
 0x1a0   :  { %v1145_v46 = vpop.eup %1144  ;;  %v679_v62 = vmul.f32 1.442695, %v635_v9  ;;  %v681_v14 = vmul.f32 1.442695, %v636_v27  ;;  %v1868_v33 = vmul.f32 0.6931472, %v1143_v25  ;;  %v945_v11 = vadd.f32 %v944_v23, %v943_v18 }
 0x1a1   :  { %v1147_v1 = vpop.eup %1146  ;;  %v707_v60 = vsub.f32 1.0, %v1145_v46  ;;  %v1864_v43 = vpop.xlane.xlu1 %580  ;;  %v756_v3 = vmul.f32 %v731_v40, %v731_v40  ;;  %v780_v61 = vmul.f32 0.25, %v755_v30  ;;  %v608_v15 = vsub.f32 %v1823_v13, %v1825_v54 }
 0x1a2   :  { %v1866_v53 = vpop.xlane.xlu0 %583  ;;  %1154 = vpow2.f32 %v679_v62  ;;  %v637_v59 = vsub.f32 %v1864_v43, %v1862_v29  ;;  %v1873_v38 = vmul.f32 0.6931472, %v1147_v1  ;;  %v947_v42 = vadd.f32 %v946_v49, %v945_v11 }
 0x1a3   :  { %v732_v63 = vmax.f32 %v707_v60, 0.0  ;;  %1156 = vpow2.f32 %v681_v14  ;;  %v638_v35 = vsub.f32 %v1866_v53, %v1868_v33  ;;  %v781_v7 = vmul.f32 0.25, %v756_v3 }
 0x1a4   :  { %v1149_v36 = vpop.eup %1148  ;;  %v683_v44 = vmul.f32 1.442695, %v637_v59  ;;  %v805_v28 = vmul.f32 %v780_v61, %v605_v32  ;;  %v609_v3 = vsub.f32 %v1833_v4, %v1835_v12 }
 0x1a5   :  { %v1151_v6 = vpop.eup %1150  ;;  %v757_v0 = vmul.f32 %v732_v63, %v732_v63  ;;  %v1877_v41 = vpop.xlane.xlu1 %586  ;;  %v1879_v16 = vmul.f32 0.6931472, %v1149_v36  ;;  %v685_v2 = vmul.f32 1.442695, %v638_v35  ;;  %v806_v50 = vmul.f32 %v781_v7, %v606_v26 }
 0x1a6   :  { %v708_v31 = vsub.f32 1.0, %v1151_v6  ;;  %v1882_v51 = vpop.xlane.xlu0 %589  ;;  %1158 = vpow2.f32 %v683_v44  ;;  %v639_v17 = vsub.f32 %v1877_v41, %v1873_v38  ;;  %v948_v9 = vsel %vm920_vm0, %v805_v28, 0.0 }
 0x1a7   :  { %v782_v55 = vmul.f32 0.25, %v757_v0  ;;  %1160 = vpow2.f32 %v685_v2  ;;  %v640_v21 = vsub.f32 %v1882_v51, %v1879_v16  ;;  %v950_v48 = vsel %vm920_vm0, %v806_v50, 0.0 }
 0x1a8   :  { %v733_v10 = vmax.f32 %v708_v31, 0.0  ;;  %v1153_v56 = vpop.eup %1152  ;;  %v687_v5 = vmul.f32 1.442695, %v639_v17  ;;  %v949_v40 = vadd.f32 %v948_v9, %v947_v42  ;;  %v610_v7 = vsub.f32 %v1844_v52, %v1848_v45 }
 0x1a9   :  { %v709_v57 = vsub.f32 1.0, %v1153_v56  ;;  %v807_v25 = vmul.f32 %v782_v55, %v607_v47  ;;  %v689_v34 = vmul.f32 1.442695, %v640_v21  ;;  %v611_v44 = vsub.f32 %v1846_v58, %v1850_v22 }
 0x1aa   :  { %v758_v32 = vmul.f32 %v733_v10, %v733_v10  ;;  %1162 = vpow2.f32 %v687_v5  ;;  %v951_v37 = vadd.f32 %v950_v48, %v949_v40  ;;  %v612_v58 = vsub.f32 %v1862_v29, %v1864_v43 }
 0x1ab   :  { %v734_v46 = vmax.f32 %v709_v57, 0.0  ;;  %1164 = vpow2.f32 %v689_v34  ;;  %v952_v60 = vsel %vm920_vm0, %v807_v25, 0.0  ;;  %v613_v21 = vsub.f32 %v1868_v33, %v1866_v53 }
 0x1ac   :  { %v1155_v30 = vpop.eup %1154  ;;  %v783_v27 = vmul.f32 0.25, %v758_v32  ;;  %v953_v8 = vadd.f32 %v952_v60, %v951_v37  ;;  %v615_v53 = vsub.f32 %v1879_v16, %v1882_v51 }
 0x1ad   :  { %v1157_v26 = vpop.eup %1156  ;;  %v710_v24 = vsub.f32 1.0, %v1155_v30  ;;  %v759_v1 = vmul.f32 %v734_v46, %v734_v46 }
 0x1ae   :  { %v808_v62 = vmul.f32 %v783_v27, %v608_v15  ;;  %v711_v19 = vsub.f32 1.0, %v1157_v26  ;;  %v614_v15 = vsub.f32 %v1873_v38, %v1877_v41  ;;  %v1191_v38 = vmov 0.0  }
 0x1af   :  { %v735_v14 = vmax.f32 %v710_v24, 0.0  ;;  %v784_v61 = vmul.f32 0.25, %v759_v1  ;;  %62 = vst.msk [vmem:[#allocation2] sm:$0x1] %vm61_vm11, %v1191_v38 }
 0x1b0   :  { %v736_v13 = vmax.f32 %v711_v19, 0.0  ;;  %v1159_v54 = vpop.eup %1158  ;;  %v954_v63 = vsel %vm920_vm0, %v808_v62, 0.0 }
 0x1b1   :  { %v760_v59 = vmul.f32 %v735_v14, %v735_v14  ;;  %v1161_v36 = vpop.eup %1160  ;;  %v809_v39 = vmul.f32 %v784_v61, %v609_v3  ;;  %v712_v6 = vsub.f32 1.0, %v1159_v54  ;;  %v955_v4 = vadd.f32 %v954_v63, %v953_v8 }
 0x1b2   :  { %v761_v35 = vmul.f32 %v736_v13, %v736_v13  ;;  %v713_v20 = vsub.f32 1.0, %v1161_v36 }
 0x1b3   :  { %v785_v0 = vmul.f32 0.25, %v760_v59  ;;  %v956_v12 = vsel %vm920_vm0, %v809_v39, 0.0  ;;  %v737_v31 = vmax.f32 %v712_v6, 0.0 }
 0x1b4   :  { %v786_v23 = vmul.f32 0.25, %v761_v35  ;;  %v1163_v2 = vpop.eup %1162  ;;  %v738_v55 = vmax.f32 %v713_v20, 0.0  ;;  %v957_v17 = vadd.f32 %v956_v12, %v955_v4 }
 0x1b5   :  { %v810_v28 = vmul.f32 %v785_v0, %v610_v7  ;;  %v762_v47 = vmul.f32 %v737_v31, %v737_v31  ;;  %v714_v10 = vsub.f32 1.0, %v1163_v2  ;;  %v1165_v56 = vpop.eup %1164 }
 0x1b6   :  { %v811_v18 = vmul.f32 %v786_v23, %v611_v44  ;;  %v763_v45 = vmul.f32 %v738_v55, %v738_v55  ;;  %v715_v32 = vsub.f32 1.0, %v1165_v56  ;;  %v919_v61 = vld [vmem:[#allocation2] sm:$0x1] }
 0x1b7   :  { %v958_v52 = vsel %vm920_vm0, %v810_v28, 0.0  ;;  %v787_v22 = vmul.f32 0.25, %v762_v47  ;;  %v739_v50 = vmax.f32 %v714_v10, 0.0 }
 0x1b8   :  { %v959_v49 = vadd.f32 %v958_v52, %v957_v17  ;;  %v960_v5 = vsel %vm920_vm0, %v811_v18, 0.0  ;;  %v788_v11 = vmul.f32 0.25, %v763_v45  ;;  %v740_v30 = vmax.f32 %v715_v32, 0.0 }
 0x1b9   :  { %v812_v9 = vmul.f32 %v787_v22, %v612_v58  ;;  %v764_v25 = vmul.f32 %v739_v50, %v739_v50 }
 0x1ba   :  { %v961_v57 = vadd.f32 %v960_v5, %v959_v49  ;;  %v813_v34 = vmul.f32 %v788_v11, %v613_v21  ;;  %v765_v27 = vmul.f32 %v740_v30, %v740_v30 }
 0x1bb   :  { %v962_v42 = vsel %vm920_vm0, %v812_v9, 0.0  ;;  %v789_v29 = vmul.f32 0.25, %v764_v25 }
 0x1bc   :  { %v963_v43 = vadd.f32 %v962_v42, %v961_v57  ;;  %v964_v46 = vsel %vm920_vm0, %v813_v34, 0.0  ;;  %v790_v33 = vmul.f32 0.25, %v765_v27 }
 0x1bd   :  { %v814_v26 = vmul.f32 %v789_v29, %v614_v15 }
 0x1be   :  { %v965_v48 = vadd.f32 %v964_v46, %v963_v43  ;;  %v815_v40 = vmul.f32 %v790_v33, %v615_v53 }
 0x1bf   :  { %v966_v24 = vsel %vm920_vm0, %v814_v26, 0.0 }
 0x1c0   :  { %v967_v62 = vadd.f32 %v966_v24, %v965_v48  ;;  %v968_v1 = vsel %vm920_vm0, %v815_v40, 0.0 }
 0x1c2   :  { %v969_v19 = vadd.f32 %v968_v1, %v967_v62 }
 0x1c4   :  { %970 = vadd.xlane.f32.xlu1 %v969_v19 }
 0x251   :  { %v971_v41 = vpop.xlane.xlu1 %970 }
 0x252   :  { %v972_v60 = vrot.slane %v971_v41, 4 }
 0x254   :  { %v973_v14 = vadd.f32 %v972_v60, %v971_v41 }
 0x256   :  { %v974_v37 = vrot.slane %v973_v14, 2 }
 0x258   :  { %v975_v3 = vadd.f32 %v974_v37, %v973_v14 }
 0x25a   :  { %v976_v16 = vrot.slane %v975_v3, 1 }
 0x25c   :  { %v977_v51 = vadd.f32 %v976_v16, %v975_v3 }
 0x25e   :  { %1009 = vpush %v977_v51 }
 0x28f   :  { %s1010_s24 = spop %1009 }
 0x290   :  { %v979_v13 = vstv %s1010_s24 }
 0x291   :  { %v980_v54 = vadd.f32 %v979_v13, %v919_v61 }
 0x293   :  { %982 = vst.msk [vmem:[#allocation2] sm:$0x1] %vm61_vm11, %v980_v54 }
 0x294   :  { %1177 = shalt.err (!%p1174_p4)
}
 0x295   :  { %s1178_s29 = scalar_lea.hbm %s1937_s2, 16 }
 0x296   :  { %p1179_p5 = scmp.ne.s32.totalorder %s1937_s2, %s1178_s29  ;;  %p1182_p6 = scmp.lt.u32.totalorder %s1178_s29, %s1937_s2 }
 0x298   :  { %p1184_p7 = pnand %p1182_p6, %p1179_p5 }
 0x29a   :  { %1187 = shalt.err (!%p1184_p7)
}
 0x29b   :  { %992 = dma.vmem_to_hbm [thread:$0]  %s990_s23, 16, %s1937_s2, [#allocation3]  }
 0x29c   :  { %1188 = dma.done.wait [#allocation3], 16  }
 0x29d   :  { %1189 = vsyncadd [#allocation3], 4294967280 }
 0x29e   :  { %996 = vsyncpa [#allocation3], 1 }

</bundles_post_ra>
